<compile_context>
chip_gen: v7x
topology: tpu7x:2x2x1
jax: 0.10.0
libtpu: 0.0.40
codegen_flags: <defaults>
</compile_context>

<pallas_src>
import functools

import jax
import jax.numpy as jnp
from jax.experimental import pallas as pl
from jax.experimental.pallas import tpu as pltpu


def _round_up(n, m):
    return ((n + m - 1) // m) * m


def lstm_kernel(xp_ref, whh_ref, h_out_ref):
    """LSTM recurrence over the full window for one batch tile; emits h_T.

    xp_ref   : (T, 4H, tile_b) precomputed input projection + combined bias,
               gate order (i, f, g, o) along rows; i/f/o rows pre-scaled by 0.5.
    whh_ref  : (4H, H)          packed recurrent weights (i/f/o rows pre-scaled by 0.5).
    h_out_ref: (H, tile_b)      final hidden state h_T (hidden on sublanes, batch on lanes).
    """
    T, H4, tile_b = xp_ref.shape
    H = H4 // 4

    # Hoist the grid-/loop-invariant pieces out of the timestep loop.
    whh = whh_ref[...]                                           # (4H, H)
    row = jax.lax.broadcasted_iota(jnp.int32, (H4, tile_b), 0)
    is_g = (row >= 2 * H) & (row < 3 * H)
    # sigmoid(z) = 0.5*tanh(0.5*z) + 0.5; the 0.5 input scale is folded into the
    # weights in the wrapper, so post-tanh we apply 0.5*t + 0.5 on i/f/o rows
    # and identity on g rows.
    out_scale = jnp.where(is_g, 1.0, 0.5).astype(jnp.float32)    # (4H, tile_b)
    out_offset = jnp.where(is_g, 0.0, 0.5).astype(jnp.float32)   # (4H, tile_b)

    h = jnp.zeros((H, tile_b), jnp.float32)
    c = jnp.zeros((H, tile_b), jnp.float32)

    # T == window_size is a small static constant (5), so Python unroll is fine.
    # TODO(synk): switch to lax.fori_loop(..., unroll=True) if window_size grows large.
    for t in range(T):
        # One packed MXU matmul per timestep + precomputed input slab.
        pre = xp_ref[t] + jnp.dot(whh, h, preferred_element_type=jnp.float32)  # (4H, tile_b)
        g_all = out_scale * jnp.tanh(pre) + out_offset
        i_g = g_all[0 * H:1 * H, :]
        f_g = g_all[1 * H:2 * H, :]
        g_g = g_all[2 * H:3 * H, :]
        o_g = g_all[3 * H:4 * H, :]
        c = f_g * c + i_g * g_g
        h = o_g * jnp.tanh(c)

    h_out_ref[...] = h


def init_params(key, input_size, hidden_size):
    """Deterministic parameter init mirroring the PyTorch module's shapes."""
    k_lstm = 1.0 / jnp.sqrt(jnp.float32(hidden_size))
    k_lin = 1.0 / jnp.sqrt(jnp.float32(hidden_size))
    ks = jax.random.split(key, 6)
    u = lambda k, shape, scale: jax.random.uniform(
        k, shape, dtype=jnp.float32, minval=-scale, maxval=scale)
    return {
        "weight_ih": u(ks[0], (4 * hidden_size, input_size), k_lstm),
        "weight_hh": u(ks[1], (4 * hidden_size, hidden_size), k_lstm),
        "bias_ih":   u(ks[2], (4 * hidden_size,), k_lstm),
        "bias_hh":   u(ks[3], (4 * hidden_size,), k_lstm),
        "dense_w":   u(ks[4], (1, hidden_size), k_lin),   # nn.Linear(hidden, 1).weight
        "dense_b":   u(ks[5], (1,), k_lin),               # nn.Linear(hidden, 1).bias
    }


@functools.partial(jax.jit, static_argnames=("tile_b",))
def acmtp10_lstm_forward(x, params, *, tile_b=None):
    """Equivalent of ACMTP10LSTMModel.forward (eval mode). x: (B, T, 1) -> (B,)."""
    B, T, I = x.shape
    assert I == 1, "ACMTP10 model has a single input feature"
    H = params["weight_hh"].shape[1]
    H4 = 4 * H

    # Batch lives on the lane axis inside the kernel -> tile must be a multiple
    # of 128. Default: a single tile covering the whole (padded) batch unless
    # the batch is large, in which case cap the tile (v7x can then shard the
    # resulting grid across its two TensorCores via dimension_semantics).
    if tile_b is None:
        tile_b = min(512, _round_up(B, 128))
    tile_b = _round_up(tile_b, 128)
    B_pad = _round_up(B, tile_b)

    # ---- wrapper-side layout plumbing (one-time, outside the kernel) ----
    xs = x.astype(jnp.float32).reshape(B, T)                 # squeeze I == 1
    if B_pad != B:
        xs = jnp.pad(xs, ((0, B_pad - B), (0, 0)))

    wih = params["weight_ih"].astype(jnp.float32).reshape(H4)        # (4H,) since I == 1
    whh = params["weight_hh"].astype(jnp.float32)                    # (4H, H)
    bias = (params["bias_ih"] + params["bias_hh"]).astype(jnp.float32)  # (4H,)

    # Fold the 0.5 sigmoid-input scale into the i/f/o rows (gate order i,f,g,o).
    rows = jnp.arange(H4)
    pre_scale = jnp.where((rows >= 2 * H) & (rows < 3 * H), 1.0, 0.5).astype(jnp.float32)
    w_eff = wih * pre_scale                                   # (4H,)
    b_eff = bias * pre_scale                                  # (4H,)
    whh_eff = whh * pre_scale[:, None]                        # (4H, H)

    # Precompute the full input projection + bias, batch-on-lanes: (T, 4H, B_pad).
    xproj = xs.T[:, None, :] * w_eff[None, :, None] + b_eff[None, :, None]

    grid = (B_pad // tile_b,)
    h_last = pl.pallas_call(
        lstm_kernel,
        out_shape=jax.ShapeDtypeStruct((H, B_pad), jnp.float32),
        grid=grid,
        in_specs=[
            pl.BlockSpec((T, H4, tile_b), lambda i: (0, 0, i)),  # batch-tiled input slab
            pl.BlockSpec((H4, H), lambda i: (0, 0)),             # VMEM-resident weights
        ],
        out_specs=pl.BlockSpec((H, tile_b), lambda i: (0, i)),
        compiler_params=pltpu.CompilerParams(
            dimension_semantics=("parallel",)),
    )(xproj, whh_eff)

    # Dropout(eval) is identity; dense(h_T) + flatten in the wrapper.
    # (1, H) @ (H, B_pad) -> (1, B_pad): no transpose needed in this layout.
    y = jnp.dot(params["dense_w"].astype(jnp.float32), h_last)[:, :B]
    y = y + params["dense_b"].astype(jnp.float32)[:, None]
    return y.reshape(-1)                                      # torch.flatten(val)


def reference_forward(x, params):
    """Pure-JAX reference (same math as nn.LSTM + Linear, eval-mode dropout)."""
    H = params["weight_hh"].shape[1]
    wih, whh = params["weight_ih"], params["weight_hh"]
    b = params["bias_ih"] + params["bias_hh"]
    B, T, _ = x.shape
    h = jnp.zeros((B, H), jnp.float32)
    c = jnp.zeros((B, H), jnp.float32)
    for t in range(T):
        gates = x[:, t, :] @ wih.T + h @ whh.T + b
        i_g = jax.nn.sigmoid(gates[:, 0 * H:1 * H])
        f_g = jax.nn.sigmoid(gates[:, 1 * H:2 * H])
        g_g = jnp.tanh(gates[:, 2 * H:3 * H])
        o_g = jax.nn.sigmoid(gates[:, 3 * H:4 * H])
        c = f_g * c + i_g * g_g
        h = o_g * jnp.tanh(c)
    return (h @ params["dense_w"].T + params["dense_b"]).reshape(-1)


if __name__ == "__main__":
    # Shapes implied by the module: input_size = 1 feature ('ACMTP10'),
    # window_size = 5, hidden_size = 32. Small batch; batch is padded to 128
    # lanes so the whole thing runs as a single grid step.
    batch, window_size, input_size, hidden_size = 32, 5, 1, 32

    key = jax.random.PRNGKey(0)
    kx, kp = jax.random.split(key)
    x = jax.random.normal(kx, (batch, window_size, input_size), dtype=jnp.float32)
    params = init_params(kp, input_size, hidden_size)

    y = acmtp10_lstm_forward(x, params)
    y = jax.block_until_ready(y)

    y_ref = reference_forward(x, params)
    assert y.shape == (batch,)
    assert jnp.allclose(y, y_ref, atol=1e-4, rtol=1e-4), (y, y_ref)

    print("KERNEL_OK")
</pallas_src>

<mosaic_0001>
module attributes {stable_mosaic.version = 11 : i64} {
  func.func @lstm_kernel(%arg0: i32, %arg1: memref<5x128x128xf32, #tpu.memory_space<vmem>>, %arg2: memref<128x32xf32, #tpu.memory_space<vmem>>, %arg3: memref<32x128xf32, #tpu.memory_space<vmem>>) attributes {dimension_semantics = [#tpu.dimension_semantics<parallel>], iteration_bounds = array<i64: 1>, scalar_prefetch = 0 : i64, scratch_operands = 0 : i64, tpu.core_type = #tpu.core_type<tc>, window_params = [{transform_indices = @transform_0, window_bounds = array<i64: 5, 128, 128>}, {pipeline_mode = #tpu.pipeline_mode<synchronous>, transform_indices = @transform_1, window_bounds = array<i64: 128, 32>}, {transform_indices = @transform_2, window_bounds = array<i64: 32, 128>}]} {
    %c0 = arith.constant 0 : index
    %c0_0 = arith.constant 0 : index
    %0 = vector.load %arg2[%c0, %c0_0] : memref<128x32xf32, #tpu.memory_space<vmem>>, vector<128x32xf32>
    %1 = tpu.iota {dimensions = array<i32: 0>} : vector<128x128xi32>
    %c64_i32 = arith.constant 64 : i32
    %2 = vector.broadcast %c64_i32 : i32 to vector<128x128xi32>
    %3 = arith.cmpi sge, %1, %2 : vector<128x128xi32>
    %c96_i32 = arith.constant 96 : i32
    %4 = vector.broadcast %c96_i32 : i32 to vector<128x128xi32>
    %5 = arith.cmpi slt, %1, %4 : vector<128x128xi32>
    %6 = arith.andi %3, %5 : vector<128x128xi1>
    %cst = arith.constant 1.000000e+00 : f32
    %cst_1 = arith.constant 5.000000e-01 : f32
    %7 = vector.broadcast %cst : f32 to vector<128x128xf32>
    %8 = vector.broadcast %cst_1 : f32 to vector<128x128xf32>
    %9 = arith.select %6, %7, %8 : vector<128x128xi1>, vector<128x128xf32>
    %cst_2 = arith.constant 0.000000e+00 : f32
    %cst_3 = arith.constant 5.000000e-01 : f32
    %10 = vector.broadcast %cst_2 : f32 to vector<128x128xf32>
    %11 = vector.broadcast %cst_3 : f32 to vector<128x128xf32>
    %12 = arith.select %6, %10, %11 : vector<128x128xi1>, vector<128x128xf32>
    %cst_4 = arith.constant 0.000000e+00 : f32
    %13 = vector.broadcast %cst_4 : f32 to vector<32x128xf32>
    %cst_5 = arith.constant 0.000000e+00 : f32
    %14 = vector.broadcast %cst_5 : f32 to vector<32x128xf32>
    %c0_6 = arith.constant 0 : index
    %c0_7 = arith.constant 0 : index
    %c0_8 = arith.constant 0 : index
    %15 = vector.load %arg1[%c0_6, %c0_7, %c0_8] : memref<5x128x128xf32, #tpu.memory_space<vmem>>, vector<1x128x128xf32>
    %16 = vector.shape_cast %15 : vector<1x128x128xf32> to vector<128x128xf32>
    %cst_9 = arith.constant dense<0.000000e+00> : vector<128x128xf32>
    %17 = tpu.matmul %0, %13, %cst_9 {dimension_numbers = #tpu.dot_dimension_numbers<[1], [0], [0], [1], [0, 0, 1, 1], [], []>} : vector<128x32xf32>, vector<32x128xf32>, vector<128x128xf32> -> vector<128x128xf32>
    %18 = arith.addf %16, %17 : vector<128x128xf32>
    %19 = math.tanh %18 : vector<128x128xf32>
    %20 = arith.mulf %9, %19 : vector<128x128xf32>
    %21 = arith.addf %20, %12 : vector<128x128xf32>
    %22 = vector.extract_strided_slice %21 {offsets = [0, 0], sizes = [32, 128], strides = [1, 1]} : vector<128x128xf32> to vector<32x128xf32>
    %23 = vector.extract_strided_slice %21 {offsets = [32, 0], sizes = [32, 128], strides = [1, 1]} : vector<128x128xf32> to vector<32x128xf32>
    %24 = vector.extract_strided_slice %21 {offsets = [64, 0], sizes = [32, 128], strides = [1, 1]} : vector<128x128xf32> to vector<32x128xf32>
    %25 = vector.extract_strided_slice %21 {offsets = [96, 0], sizes = [32, 128], strides = [1, 1]} : vector<128x128xf32> to vector<32x128xf32>
    %26 = arith.mulf %23, %14 : vector<32x128xf32>
    %27 = arith.mulf %22, %24 : vector<32x128xf32>
    %28 = arith.addf %26, %27 : vector<32x128xf32>
    %29 = math.tanh %28 : vector<32x128xf32>
    %30 = arith.mulf %25, %29 : vector<32x128xf32>
    %c1 = arith.constant 1 : index
    %c0_10 = arith.constant 0 : index
    %c0_11 = arith.constant 0 : index
    %31 = vector.load %arg1[%c1, %c0_10, %c0_11] : memref<5x128x128xf32, #tpu.memory_space<vmem>>, vector<1x128x128xf32>
    %32 = vector.shape_cast %31 : vector<1x128x128xf32> to vector<128x128xf32>
    %cst_12 = arith.constant dense<0.000000e+00> : vector<128x128xf32>
    %33 = tpu.matmul %0, %30, %cst_12 {dimension_numbers = #tpu.dot_dimension_numbers<[1], [0], [0], [1], [0, 0, 1, 1], [], []>} : vector<128x32xf32>, vector<32x128xf32>, vector<128x128xf32> -> vector<128x128xf32>
    %34 = arith.addf %32, %33 : vector<128x128xf32>
    %35 = math.tanh %34 : vector<128x128xf32>
    %36 = arith.mulf %9, %35 : vector<128x128xf32>
    %37 = arith.addf %36, %12 : vector<128x128xf32>
    %38 = vector.extract_strided_slice %37 {offsets = [0, 0], sizes = [32, 128], strides = [1, 1]} : vector<128x128xf32> to vector<32x128xf32>
    %39 = vector.extract_strided_slice %37 {offsets = [32, 0], sizes = [32, 128], strides = [1, 1]} : vector<128x128xf32> to vector<32x128xf32>
    %40 = vector.extract_strided_slice %37 {offsets = [64, 0], sizes = [32, 128], strides = [1, 1]} : vector<128x128xf32> to vector<32x128xf32>
    %41 = vector.extract_strided_slice %37 {offsets = [96, 0], sizes = [32, 128], strides = [1, 1]} : vector<128x128xf32> to vector<32x128xf32>
    %42 = arith.mulf %39, %28 : vector<32x128xf32>
    %43 = arith.mulf %38, %40 : vector<32x128xf32>
    %44 = arith.addf %42, %43 : vector<32x128xf32>
    %45 = math.tanh %44 : vector<32x128xf32>
    %46 = arith.mulf %41, %45 : vector<32x128xf32>
    %c2 = arith.constant 2 : index
    %c0_13 = arith.constant 0 : index
    %c0_14 = arith.constant 0 : index
    %47 = vector.load %arg1[%c2, %c0_13, %c0_14] : memref<5x128x128xf32, #tpu.memory_space<vmem>>, vector<1x128x128xf32>
    %48 = vector.shape_cast %47 : vector<1x128x128xf32> to vector<128x128xf32>
    %cst_15 = arith.constant dense<0.000000e+00> : vector<128x128xf32>
    %49 = tpu.matmul %0, %46, %cst_15 {dimension_numbers = #tpu.dot_dimension_numbers<[1], [0], [0], [1], [0, 0, 1, 1], [], []>} : vector<128x32xf32>, vector<32x128xf32>, vector<128x128xf32> -> vector<128x128xf32>
    %50 = arith.addf %48, %49 : vector<128x128xf32>
    %51 = math.tanh %50 : vector<128x128xf32>
    %52 = arith.mulf %9, %51 : vector<128x128xf32>
    %53 = arith.addf %52, %12 : vector<128x128xf32>
    %54 = vector.extract_strided_slice %53 {offsets = [0, 0], sizes = [32, 128], strides = [1, 1]} : vector<128x128xf32> to vector<32x128xf32>
    %55 = vector.extract_strided_slice %53 {offsets = [32, 0], sizes = [32, 128], strides = [1, 1]} : vector<128x128xf32> to vector<32x128xf32>
    %56 = vector.extract_strided_slice %53 {offsets = [64, 0], sizes = [32, 128], strides = [1, 1]} : vector<128x128xf32> to vector<32x128xf32>
    %57 = vector.extract_strided_slice %53 {offsets = [96, 0], sizes = [32, 128], strides = [1, 1]} : vector<128x128xf32> to vector<32x128xf32>
    %58 = arith.mulf %55, %44 : vector<32x128xf32>
    %59 = arith.mulf %54, %56 : vector<32x128xf32>
    %60 = arith.addf %58, %59 : vector<32x128xf32>
    %61 = math.tanh %60 : vector<32x128xf32>
    %62 = arith.mulf %57, %61 : vector<32x128xf32>
    %c3 = arith.constant 3 : index
    %c0_16 = arith.constant 0 : index
    %c0_17 = arith.constant 0 : index
    %63 = vector.load %arg1[%c3, %c0_16, %c0_17] : memref<5x128x128xf32, #tpu.memory_space<vmem>>, vector<1x128x128xf32>
    %64 = vector.shape_cast %63 : vector<1x128x128xf32> to vector<128x128xf32>
    %cst_18 = arith.constant dense<0.000000e+00> : vector<128x128xf32>
    %65 = tpu.matmul %0, %62, %cst_18 {dimension_numbers = #tpu.dot_dimension_numbers<[1], [0], [0], [1], [0, 0, 1, 1], [], []>} : vector<128x32xf32>, vector<32x128xf32>, vector<128x128xf32> -> vector<128x128xf32>
    %66 = arith.addf %64, %65 : vector<128x128xf32>
    %67 = math.tanh %66 : vector<128x128xf32>
    %68 = arith.mulf %9, %67 : vector<128x128xf32>
    %69 = arith.addf %68, %12 : vector<128x128xf32>
    %70 = vector.extract_strided_slice %69 {offsets = [0, 0], sizes = [32, 128], strides = [1, 1]} : vector<128x128xf32> to vector<32x128xf32>
    %71 = vector.extract_strided_slice %69 {offsets = [32, 0], sizes = [32, 128], strides = [1, 1]} : vector<128x128xf32> to vector<32x128xf32>
    %72 = vector.extract_strided_slice %69 {offsets = [64, 0], sizes = [32, 128], strides = [1, 1]} : vector<128x128xf32> to vector<32x128xf32>
    %73 = vector.extract_strided_slice %69 {offsets = [96, 0], sizes = [32, 128], strides = [1, 1]} : vector<128x128xf32> to vector<32x128xf32>
    %74 = arith.mulf %71, %60 : vector<32x128xf32>
    %75 = arith.mulf %70, %72 : vector<32x128xf32>
    %76 = arith.addf %74, %75 : vector<32x128xf32>
    %77 = math.tanh %76 : vector<32x128xf32>
    %78 = arith.mulf %73, %77 : vector<32x128xf32>
    %c4 = arith.constant 4 : index
    %c0_19 = arith.constant 0 : index
    %c0_20 = arith.constant 0 : index
    %79 = vector.load %arg1[%c4, %c0_19, %c0_20] : memref<5x128x128xf32, #tpu.memory_space<vmem>>, vector<1x128x128xf32>
    %80 = vector.shape_cast %79 : vector<1x128x128xf32> to vector<128x128xf32>
    %cst_21 = arith.constant dense<0.000000e+00> : vector<128x128xf32>
    %81 = tpu.matmul %0, %78, %cst_21 {dimension_numbers = #tpu.dot_dimension_numbers<[1], [0], [0], [1], [0, 0, 1, 1], [], []>} : vector<128x32xf32>, vector<32x128xf32>, vector<128x128xf32> -> vector<128x128xf32>
    %82 = arith.addf %80, %81 : vector<128x128xf32>
    %83 = math.tanh %82 : vector<128x128xf32>
    %84 = arith.mulf %9, %83 : vector<128x128xf32>
    %85 = arith.addf %84, %12 : vector<128x128xf32>
    %86 = vector.extract_strided_slice %85 {offsets = [0, 0], sizes = [32, 128], strides = [1, 1]} : vector<128x128xf32> to vector<32x128xf32>
    %87 = vector.extract_strided_slice %85 {offsets = [32, 0], sizes = [32, 128], strides = [1, 1]} : vector<128x128xf32> to vector<32x128xf32>
    %88 = vector.extract_strided_slice %85 {offsets = [64, 0], sizes = [32, 128], strides = [1, 1]} : vector<128x128xf32> to vector<32x128xf32>
    %89 = vector.extract_strided_slice %85 {offsets = [96, 0], sizes = [32, 128], strides = [1, 1]} : vector<128x128xf32> to vector<32x128xf32>
    %90 = arith.mulf %87, %76 : vector<32x128xf32>
    %91 = arith.mulf %86, %88 : vector<32x128xf32>
    %92 = arith.addf %90, %91 : vector<32x128xf32>
    %93 = math.tanh %92 : vector<32x128xf32>
    %94 = arith.mulf %89, %93 : vector<32x128xf32>
    %c0_22 = arith.constant 0 : index
    %c0_23 = arith.constant 0 : index
    %95 = vector.load %arg3[%c0_22, %c0_23] : memref<32x128xf32, #tpu.memory_space<vmem>>, vector<32x128xf32>
    tpu.vector_store %arg3[%c0_22, %c0_23], %94 {strides = array<i32>} : memref<32x128xf32, #tpu.memory_space<vmem>>, vector<32x128xf32>,
    return
  }
  func.func @transform_0(%arg0: i32) -> (i32, i32, i32) {
    %c0_i32 = arith.constant 0 : i32
    %c0_i32_0 = arith.constant 0 : i32
    %c0_i32_1 = arith.constant 0 : i32
    return %c0_i32, %c0_i32_0, %arg0 : i32, i32, i32
  }
  func.func @transform_1(%arg0: i32) -> (i32, i32) {
    %c0_i32 = arith.constant 0 : i32
    %c0_i32_0 = arith.constant 0 : i32
    %c0_i32_1 = arith.constant 0 : i32
    return %c0_i32, %c0_i32_0 : i32, i32
  }
  func.func @transform_2(%arg0: i32) -> (i32, i32) {
    %c0_i32 = arith.constant 0 : i32
    %c0_i32_0 = arith.constant 0 : i32
    return %c0_i32, %arg0 : i32, i32
  }
}

</mosaic_0001>

<bundles_post_ra>
// kernel: acmtp10_lstm_forward.1
= control target key start
LH: loop header
LB: loop body
LE: loop exit
PB: predicated region body
PF: predicated region fallthrough
CT: control target
= control target key end

     0   :  { %vm140_vm0 = vcmask 261120   ;;  %v2055_v0 = vmov 0.0   ;;  %s2657_s1 = inlined_call_operand.vmem [shape: f32[128,32], index: 1, kind: input, shape index: {}]   ;;  %s2658_s0 = inlined_call_operand.vmem [shape: f32[5,128,128], index: 0, kind: input, shape index: {}]   ;;  %s2659_s2 = inlined_call_operand.vmem [shape: f32[32,128], index: 2, kind: output, shape index: {}]  }
   0x1   :  { %1651 = vmatprep.subr.mxu0 %v2055_v0  ;;  %v2074_v1 = vld [vmem:[%s2657_s1] sm:$0xff]  ;;  %v2079_v2 = vld [vmem:[%s2657_s1 + $0x8] sm:$0xff]  ;;  %1837 = vmatprep.subr.mxu1 %v2055_v0  ;;  %v2084_v3 = vld [vmem:[%s2657_s1 + $0x10] sm:$0xff] }
   0x2   :  { %1652 = vmatpush3.msra.mxu0 %v2055_v0  ;;  %1653 = vmatprep.mubr.msk.f32.mxu0 %vm140_vm0, %v2074_v1  ;;  %v2091_v4 = vld [vmem:[%s2657_s1 + $0x40] sm:$0xff]  ;;  %v2096_v5 = vld [vmem:[%s2657_s1 + $0x48] sm:$0xff]  ;;  %v2103_v6 = vld [vmem:[%s2657_s1 + $0x50] sm:$0xff] }
   0x3   :  { %1654 = vmatmul.mubr.msk.f32.vlgmr.msra.gmra.mrb[0].mxu0 %vm140_vm0, %v2079_v2  ;;  %1838 = vmatpush3.msra.mxu1 %v2055_v0  ;;  %v2112_v7 = vld [vmem:[%s2657_s1 + $0x18] sm:$0xff]  ;;  %v2119_v8 = vld [vmem:[%s2657_s1 + $0x20] sm:$0xff]  ;;  %v2140_v11 = vld [vmem:[%s2657_s1 + $0x28] sm:$0xff] }
   0x4   :  { %1656 = vmatprep.mubr.msk.f32.mxu0 %vm140_vm0, %v2084_v3  ;;  %1665 = vmatprep.mubr.msk.f32.mxu1 %vm140_vm0, %v2091_v4  ;;  %v2126_v9 = vld [vmem:[%s2657_s1 + $0x58] sm:$0xff]  ;;  %v2133_v10 = vld [vmem:[%s2657_s1 + $0x60] sm:$0xff]  ;;  %v2147_v12 = vld [vmem:[%s2657_s1 + $0x30] sm:$0xff] }
   0x5   :  { %1666 = vmatmul.mubr.msk.f32.vlgmr.msra.gmra.mrb[0].mxu1 %vm140_vm0, %v2096_v5  ;;  %v2154_v13 = vld [vmem:[%s2657_s1 + $0x68] sm:$0xff]  ;;  %v2161_v14 = vld [vmem:[%s2657_s1 + $0x70] sm:$0xff]  ;;  %v2168_v15 = vld [vmem:[%s2657_s1 + $0x38] sm:$0xff] }
   0x6   :  { %1668 = vmatprep.mubr.msk.f32.mxu1 %vm140_vm0, %v2103_v6  ;;  %v2177_v16 = vld [vmem:[%s2657_s1 + $0x78] sm:$0xff]  ;;  %v125_v17 = vld [vmem:[%s2658_s0 + $0x8] sm:$0xff]  ;;  %v124_v18 = vld [vmem:[%s2658_s0] sm:$0xff] }
   0x7   :  { %1657 = vmatmul.mubr.msk.f32.gmra.mrb[2].mxu0 %vm140_vm0, %v2112_v7  ;;  %v133_v20 = vld [vmem:[%s2658_s0 + $0x48] sm:$0xff]  ;;  %v132_v23 = vld [vmem:[%s2658_s0 + $0x40] sm:$0xff]  ;;  %v127_v25 = vld [vmem:[%s2658_s0 + $0x18] sm:$0xff] }
   0x8   :  { %1659 = vmatprep.mubr.msk.f32.mxu0 %vm140_vm0, %v2119_v8  ;;  %v126_v28 = vld [vmem:[%s2658_s0 + $0x10] sm:$0xff]  ;;  %v135_v32 = vld [vmem:[%s2658_s0 + $0x58] sm:$0xff]  ;;  %v129_v37 = vld [vmem:[%s2658_s0 + $0x28] sm:$0xff] }
   0x9   :  { %1669 = vmatmul.mubr.msk.f32.gmra.mrb[2].mxu1 %vm140_vm0, %v2126_v9  ;;  %v134_v35 = vld [vmem:[%s2658_s0 + $0x50] sm:$0xff]  ;;  %v128_v40 = vld [vmem:[%s2658_s0 + $0x20] sm:$0xff]  ;;  %v131_v47 = vld [vmem:[%s2658_s0 + $0x38] sm:$0xff] }
   0xa   :  { %1671 = vmatprep.mubr.msk.f32.mxu1 %vm140_vm0, %v2133_v10  ;;  %v130_v49 = vld [vmem:[%s2658_s0 + $0x30] sm:$0xff]  ;;  %v137_v55 = vld [vmem:[%s2658_s0 + $0x68] sm:$0xff]  ;;  %v136_v59 = vld [vmem:[%s2658_s0 + $0x60] sm:$0xff] }
   0xb   :  { %1660 = vmatmul.mubr.msk.f32.gmra.mrb[4].mxu0 %vm140_vm0, %v2140_v11 }
   0xc   :  { %1662 = vmatprep.mubr.msk.f32.mxu0 %vm140_vm0, %v2147_v12 }
   0xd   :  { %1672 = vmatmul.mubr.msk.f32.gmra.mrb[4].mxu1 %vm140_vm0, %v2154_v13 }
   0xe   :  { %1674 = vmatprep.mubr.msk.f32.mxu1 %vm140_vm0, %v2161_v14 }
   0xf   :  { %1663 = vmatmul.mubr.msk.f32.gmra.mrb[6].mxu0 %vm140_vm0, %v2168_v15 }
  0x10   :  { %1717 = vmatprep.mubr.msk.f32.mxu0 %vm140_vm0, %v2074_v1 }
  0x11   :  { %1675 = vmatmul.mubr.msk.f32.gmra.mrb[6].mxu1 %vm140_vm0, %v2177_v16 }
  0x12   :  { %1685 = vmatprep.mubr.msk.f32.mxu1 %vm140_vm0, %v2074_v1 }
  0xd6   :  { %v1655_v19 = vpop.f32.mrb[0].mxu0 }
  0xd7   :  { %v335_v21 = vadd.f32 %v1655_v19, %v125_v17  ;;  %v255_v22 = vpop.f32.mrb[1].mxu0 }
  0xd8   :  { %v334_v24 = vadd.f32 %v255_v22, %v124_v18  ;;  %v1667_v26 = vpop.f32.mrb[0].mxu1  ;;  %v139_v22 = vld [vmem:[%s2658_s0 + $0x78] sm:$0xff] }
  0xd9   :  { %1840 = vtanh.f32 %v335_v21  ;;  %v343_v27 = vadd.f32 %v1667_v26, %v133_v20  ;;  %v295_v29 = vpop.f32.mrb[1].mxu1  ;;  %v138_v26 = vld [vmem:[%s2658_s0 + $0x70] sm:$0xff] }
  0xda   :  { %1842 = vtanh.f32 %v334_v24  ;;  %v1658_v30 = vpop.f32.mrb[2].mxu0  ;;  %v342_v31 = vadd.f32 %v295_v29, %v132_v23 }
  0xdb   :  { %v337_v33 = vadd.f32 %v1658_v30, %v127_v25  ;;  %1844 = vtanh.f32 %v343_v27  ;;  %v265_v34 = vpop.f32.mrb[3].mxu0 }
  0xdc   :  { %v336_v36 = vadd.f32 %v265_v34, %v126_v28  ;;  %1846 = vtanh.f32 %v342_v31  ;;  %v1670_v38 = vpop.f32.mrb[2].mxu1 }
  0xdd   :  { %1848 = vtanh.f32 %v337_v33  ;;  %v345_v39 = vadd.f32 %v1670_v38, %v135_v32  ;;  %v305_v41 = vpop.f32.mrb[3].mxu1 }
  0xde   :  { %1850 = vtanh.f32 %v336_v36  ;;  %v1661_v42 = vpop.f32.mrb[4].mxu0  ;;  %v344_v43 = vadd.f32 %v305_v41, %v134_v35 }
  0xdf   :  { %v339_v44 = vadd.f32 %v1661_v42, %v129_v37  ;;  %1852 = vtanh.f32 %v345_v39  ;;  %v275_v45 = vpop.f32.mrb[5].mxu0 }
  0xe0   :  { %v338_v46 = vadd.f32 %v275_v45, %v128_v40  ;;  %1854 = vtanh.f32 %v344_v43  ;;  %v1673_v48 = vpop.f32.mrb[4].mxu1 }
  0xe1   :  { %1856 = vtanh.f32 %v339_v44  ;;  %v315_v50 = vpop.f32.mrb[5].mxu1  ;;  %v347_v18 = vadd.f32 %v1673_v48, %v137_v55 }
  0xe2   :  { %1858 = vtanh.f32 %v338_v46  ;;  %v1664_v51 = vpop.f32.mrb[6].mxu0  ;;  %v346_v21 = vadd.f32 %v315_v50, %v136_v59 }
  0xe3   :  { %v1841_v52 = vpop.eup %1840  ;;  %v341_v53 = vadd.f32 %v1664_v51, %v131_v47  ;;  %v285_v54 = vpop.f32.mrb[7].mxu0 }
  0xe4   :  { %v1843_v56 = vpop.eup %1842  ;;  %v367_v57 = vmul.f32 0.5, %v1841_v52  ;;  %v340_v58 = vadd.f32 %v285_v54, %v130_v49  ;;  %v1676_v60 = vpop.f32.mrb[6].mxu1 }
  0xe5   :  { %v1845_v61 = vpop.eup %1844  ;;  %v366_v62 = vmul.f32 0.5, %v1843_v56  ;;  %1860 = vtanh.f32 %v341_v53  ;;  %v325_v63 = vpop.f32.mrb[7].mxu1  ;;  %v349_v32 = vadd.f32 %v1676_v60, %v139_v22 }
  0xe6   :  { %v1847_v0 = vpop.eup %1846  ;;  %v383_v17 = vadd.f32 0.5, %v367_v57  ;;  %1862 = vtanh.f32 %v340_v58  ;;  %v348_v35 = vadd.f32 %v325_v63, %v138_v26 }
  0xe7   :  { %v1849_v19 = vpop.eup %1848  ;;  %v382_v20 = vadd.f32 0.5, %v366_v62  ;;  %1864 = vtanh.f32 %v347_v18 }
  0xe8   :  { %v1851_v23 = vpop.eup %1850  ;;  %v369_v24 = vmul.f32 0.5, %v1849_v19  ;;  %v403_v25 = vmul.f32 %v1845_v61, %v383_v17  ;;  %1866 = vtanh.f32 %v346_v21 }
  0xe9   :  { %v1853_v27 = vpop.eup %1852  ;;  %v368_v28 = vmul.f32 0.5, %v1851_v23  ;;  %v402_v29 = vmul.f32 %v1847_v0, %v382_v20  ;;  %1868 = vtanh.f32 %v349_v32 }
  0xea   :  { %v1855_v30 = vpop.eup %1854  ;;  %v385_v31 = vadd.f32 0.5, %v369_v24  ;;  %1870 = vtanh.f32 %v348_v35 }
  0xeb   :  { %v1857_v33 = vpop.eup %1856  ;;  %v384_v34 = vadd.f32 0.5, %v368_v28 }
  0xec   :  { %v1859_v36 = vpop.eup %1858  ;;  %v371_v37 = vmul.f32 0.5, %v1857_v33  ;;  %v405_v38 = vmul.f32 %v1853_v27, %v385_v31  ;;  %v1427_v33 = vld [vmem:[%s2658_s0 + $0x88] sm:$0xff] }
  0xed   :  { %v370_v39 = vmul.f32 0.5, %v1859_v36  ;;  %v404_v40 = vmul.f32 %v1855_v30, %v384_v34  ;;  %v1426_v34 = vld [vmem:[%s2658_s0 + $0x80] sm:$0xff] }
  0xee   :  { %v387_v41 = vadd.f32 0.5, %v371_v37 }
  0xef   :  { %v1861_v42 = vpop.eup %1860  ;;  %v386_v43 = vadd.f32 0.5, %v370_v39  ;;  %v1429_v39 = vld [vmem:[%s2658_s0 + $0x98] sm:$0xff] }
  0xf0   :  { %v1863_v44 = vpop.eup %1862  ;;  %v399_v45 = vmul.f32 0.0, %v387_v41  ;;  %v373_v46 = vmul.f32 0.5, %v1861_v42  ;;  %v1428_v41 = vld [vmem:[%s2658_s0 + $0x90] sm:$0xff]  ;;  %v1430_v42 = vld [vmem:[%s2658_s0 + $0xa0] sm:$0xff] }
  0xf1   :  { %v398_v47 = vmul.f32 0.0, %v386_v43  ;;  %v372_v48 = vmul.f32 0.5, %v1863_v44  ;;  %v1865_v53 = vpop.eup %1864 }
  0xf2   :  { %v2235_v49 = vadd.f32 %v403_v25, %v399_v45  ;;  %v389_v50 = vadd.f32 0.5, %v373_v46  ;;  %v1867_v55 = vpop.eup %1866  ;;  %v379_v59 = vmul.f32 0.5, %v1865_v53 }
  0xf3   :  { %v2237_v51 = vadd.f32 %v402_v29, %v398_v47  ;;  %v388_v52 = vadd.f32 0.5, %v372_v48  ;;  %v1869_v60 = vpop.eup %1868  ;;  %v378_v61 = vmul.f32 0.5, %v1867_v55 }
  0xf4   :  { %1872 = vtanh.f32 %v2235_v49  ;;  %v401_v54 = vmul.f32 0.0, %v389_v50  ;;  %v1871_v62 = vpop.eup %1870  ;;  %v395_v63 = vadd.f32 0.5, %v379_v59  ;;  %v381_v0 = vmul.f32 0.5, %v1869_v60  ;;  %v1433_v50 = vld [vmem:[%s2658_s0 + $0xb8] sm:$0xff]  ;;  %v1435_v59 = vld [vmem:[%s2658_s0 + $0xc8] sm:$0xff]  ;;  %v1434_v60 = vld [vmem:[%s2658_s0 + $0xc0] sm:$0xff] }
  0xf5   :  { %1874 = vtanh.f32 %v2237_v51  ;;  %v400_v56 = vmul.f32 0.0, %v388_v52  ;;  %v394_v17 = vadd.f32 0.5, %v378_v61  ;;  %v380_v18 = vmul.f32 0.5, %v1871_v62  ;;  %v1432_v52 = vld [vmem:[%s2658_s0 + $0xb0] sm:$0xff] }
  0xf6   :  { %v2241_v57 = vadd.f32 %v405_v38, %v401_v54  ;;  %v397_v21 = vadd.f32 0.5, %v381_v0 }
  0xf7   :  { %v2243_v58 = vadd.f32 %v404_v40, %v400_v56  ;;  %v396_v23 = vadd.f32 0.5, %v380_v18  ;;  %v1431_v40 = vld [vmem:[%s2658_s0 + $0xa8] sm:$0xff] }
  0xf8   :  { %1876 = vtanh.f32 %v2241_v57 }
  0xf9   :  { %1878 = vtanh.f32 %v2243_v58 }
  0xfe   :  { %v1873_v19 = vpop.eup %1872 }
  0xff   :  { %v1875_v20 = vpop.eup %1874  ;;  %v415_v22 = vmul.f32 %v1873_v19, %v395_v63  ;;  %v1436_v19 = vld [vmem:[%s2658_s0 + $0xd0] sm:$0xff] }
 0x100   :  { %v414_v24 = vmul.f32 %v1875_v20, %v394_v17  ;;  %v1437_v17 = vld [vmem:[%s2658_s0 + $0xd8] sm:$0xff] }
 0x102   :  { %v1877_v25 = vpop.eup %1876  ;;  %v1805_v26 = vpack.c.bf16 %v415_v22, %v414_v24 }
 0x103   :  { %v1879_v27 = vpop.eup %1878  ;;  %v417_v28 = vmul.f32 %v1877_v25, %v397_v21 }
 0x104   :  { %1806 = vmatprep.subr.bf16.mxu1 %v1805_v26  ;;  %v416_v29 = vmul.f32 %v1879_v27, %v396_v23 }
 0x105   :  { %1808 = vmatpush3.bf16.msra.mxu1 %v1805_v26 }
 0x106   :  { %v1809_v30 = vpack.c.bf16 %v417_v28, %v416_v29  ;;  %v1439_v28 = vld [vmem:[%s2658_s0 + $0xe8] sm:$0xff] }
 0x108   :  { %1810 = vmatprep.subr.bf16.mxu1 %v1809_v30 }
 0x109   :  { %1812 = vmatpush3.bf16.msra.mxu1 %v1809_v30 }
 0x10c   :  { %1686 = vmatmul.mubr.msk.f32.vlgmr.msra.gmra.mrb[8].mxu1 %vm140_vm0, %v2079_v2 }
 0x10d   :  { %1688 = vmatprep.mubr.msk.f32.mxu1 %vm140_vm0, %v2084_v3 }
 0x110   :  { %1689 = vmatmul.mubr.msk.f32.gmra.mrb[10].mxu1 %vm140_vm0, %v2112_v7 }
 0x111   :  { %1691 = vmatprep.mubr.msk.f32.mxu1 %vm140_vm0, %v2119_v8 }
 0x114   :  { %1692 = vmatmul.mubr.msk.f32.gmra.mrb[12].mxu1 %vm140_vm0, %v2140_v11 }
 0x115   :  { %1694 = vmatprep.mubr.msk.f32.mxu1 %vm140_vm0, %v2147_v12 }
 0x118   :  { %1695 = vmatmul.mubr.msk.f32.gmra.mrb[14].mxu1 %vm140_vm0, %v2168_v15 }
 0x119   :  { %1697 = vmatprep.mubr.msk.f32.mxu1 %vm140_vm0, %v2091_v4 }
 0x11c   :  { %1698 = vmatmul.mubr.msk.f32.gmra.mrb[16].mxu1 %vm140_vm0, %v2096_v5 }
 0x11d   :  { %1700 = vmatprep.mubr.msk.f32.mxu1 %vm140_vm0, %v2103_v6 }
 0x120   :  { %1701 = vmatmul.mubr.msk.f32.gmra.mrb[18].mxu1 %vm140_vm0, %v2126_v9 }
 0x121   :  { %1703 = vmatprep.mubr.msk.f32.mxu1 %vm140_vm0, %v2133_v10 }
 0x124   :  { %1704 = vmatmul.mubr.msk.f32.gmra.mrb[20].mxu1 %vm140_vm0, %v2154_v13 }
 0x125   :  { %1706 = vmatprep.mubr.msk.f32.mxu1 %vm140_vm0, %v2161_v14 }
 0x128   :  { %1707 = vmatmul.mubr.msk.f32.gmra.mrb[22].mxu1 %vm140_vm0, %v2177_v16 }
 0x129   :  { %1749 = vmatprep.mubr.msk.f32.mxu1 %vm140_vm0, %v2074_v1 }
 0x1df   :  { %v1687_v31 = vpop.f32.mrb[8].mxu1 }
 0x1e0   :  { %v501_v32 = vpop.f32.mrb[9].mxu1  ;;  %v581_v36 = vadd.f32 %v1687_v31, %v1427_v33  ;;  %v1438_v31 = vld [vmem:[%s2658_s0 + $0xe0] sm:$0xff] }
 0x1e1   :  { %v580_v38 = vadd.f32 %v1426_v34, %v501_v32 }
 0x1e2   :  { %1880 = vtanh.f32 %v581_v36 }
 0x1e3   :  { %v1690_v35 = vpop.f32.mrb[10].mxu1  ;;  %1882 = vtanh.f32 %v580_v38 }
 0x1e4   :  { %v511_v37 = vpop.f32.mrb[11].mxu1  ;;  %v583_v44 = vadd.f32 %v1690_v35, %v1429_v39 }
 0x1e5   :  { %v582_v47 = vadd.f32 %v1428_v41, %v511_v37 }
 0x1e7   :  { %v1693_v43 = vpop.f32.mrb[12].mxu1 }
 0x1e8   :  { %v585_v45 = vadd.f32 %v1693_v43, %v1431_v40  ;;  %v521_v46 = vpop.f32.mrb[13].mxu1  ;;  %v1441_v43 = vld [vmem:[%s2658_s0 + $0xf8] sm:$0xff] }
 0x1e9   :  { %v584_v48 = vadd.f32 %v1430_v42, %v521_v46  ;;  %v1440_v46 = vld [vmem:[%s2658_s0 + $0xf0] sm:$0xff] }
 0x1ea   :  { %1884 = vtanh.f32 %v585_v45 }
 0x1eb   :  { %1886 = vtanh.f32 %v584_v48  ;;  %v1696_v53 = vpop.f32.mrb[14].mxu1 }
 0x1ec   :  { %1888 = vtanh.f32 %v583_v44  ;;  %v587_v54 = vadd.f32 %v1696_v53, %v1433_v50  ;;  %v531_v55 = vpop.f32.mrb[15].mxu1  ;;  %v1881_v18 = vpop.eup %1880 }
 0x1ed   :  { %1890 = vtanh.f32 %v582_v47  ;;  %v586_v56 = vadd.f32 %v1432_v52, %v531_v55  ;;  %v1883_v20 = vpop.eup %1882  ;;  %v613_v33 = vmul.f32 0.5, %v1881_v18 }
 0x1ee   :  { %1892 = vtanh.f32 %v587_v54  ;;  %v612_v36 = vmul.f32 0.5, %v1883_v20 }
 0x1ef   :  { %1894 = vtanh.f32 %v586_v56  ;;  %v1699_v61 = vpop.f32.mrb[16].mxu1  ;;  %v629_v47 = vadd.f32 0.5, %v613_v33 }
 0x1f0   :  { %v589_v62 = vadd.f32 %v1699_v61, %v1435_v59  ;;  %v541_v63 = vpop.f32.mrb[17].mxu1  ;;  %v628_v53 = vadd.f32 0.5, %v612_v36 }
 0x1f1   :  { %v588_v0 = vadd.f32 %v1434_v60, %v541_v63 }
 0x1f2   :  { %1896 = vtanh.f32 %v589_v62 }
 0x1f3   :  { %1898 = vtanh.f32 %v588_v0  ;;  %v1702_v21 = vpop.f32.mrb[18].mxu1 }
 0x1f4   :  { %v1885_v22 = vpop.eup %1884  ;;  %v591_v23 = vadd.f32 %v1702_v21, %v1437_v17  ;;  %v551_v24 = vpop.f32.mrb[19].mxu1 }
 0x1f5   :  { %v1887_v25 = vpop.eup %1886  ;;  %v617_v26 = vmul.f32 0.5, %v1885_v22  ;;  %v590_v27 = vadd.f32 %v1436_v19, %v551_v24 }
 0x1f6   :  { %v1889_v29 = vpop.eup %1888  ;;  %v616_v30 = vmul.f32 0.5, %v1887_v25  ;;  %1900 = vtanh.f32 %v591_v23 }
 0x1f7   :  { %v1891_v32 = vpop.eup %1890  ;;  %1902 = vtanh.f32 %v590_v27  ;;  %v1705_v34 = vpop.f32.mrb[20].mxu1  ;;  %v633_v40 = vadd.f32 0.5, %v617_v26  ;;  %v615_v48 = vmul.f32 0.5, %v1889_v29 }
 0x1f8   :  { %v1893_v35 = vpop.eup %1892  ;;  %v593_v37 = vadd.f32 %v1705_v34, %v1439_v28  ;;  %v561_v38 = vpop.f32.mrb[21].mxu1  ;;  %v632_v44 = vadd.f32 0.5, %v616_v30  ;;  %v614_v54 = vmul.f32 0.5, %v1891_v32 }
 0x1f9   :  { %v1895_v39 = vpop.eup %1894  ;;  %v619_v41 = vmul.f32 0.5, %v1893_v35  ;;  %v592_v42 = vadd.f32 %v1438_v31, %v561_v38  ;;  %v645_v60 = vmul.f32 %v633_v40, %v2235_v49  ;;  %v631_v19 = vadd.f32 0.5, %v615_v48 }
 0x1fa   :  { %v618_v45 = vmul.f32 0.5, %v1895_v39  ;;  %1904 = vtanh.f32 %v593_v37  ;;  %v644_v0 = vmul.f32 %v632_v44, %v2237_v51  ;;  %v630_v22 = vadd.f32 0.5, %v614_v54  ;;  %v1458_v54 = vld [vmem:[%s2658_s0 + $0x100] sm:$0xff] }
 0x1fb   :  { %1906 = vtanh.f32 %v592_v42  ;;  %v1708_v50 = vpop.f32.mrb[22].mxu1  ;;  %v635_v61 = vadd.f32 0.5, %v619_v41 }
 0x1fc   :  { %v1897_v52 = vpop.eup %1896  ;;  %v595_v55 = vadd.f32 %v1708_v50, %v1441_v43  ;;  %v571_v56 = vpop.f32.mrb[23].mxu1  ;;  %v634_v17 = vadd.f32 0.5, %v618_v45 }
 0x1fd   :  { %v1899_v59 = vpop.eup %1898  ;;  %v649_v62 = vmul.f32 %v1897_v52, %v629_v47  ;;  %v594_v63 = vadd.f32 %v1440_v46, %v571_v56  ;;  %v647_v25 = vmul.f32 %v635_v61, %v2241_v57  ;;  %v1461_v61 = vld [vmem:[%s2658_s0 + $0x118] sm:$0xff] }
 0x1fe   :  { %v648_v18 = vmul.f32 %v1899_v59, %v628_v53  ;;  %1908 = vtanh.f32 %v595_v55  ;;  %v646_v26 = vmul.f32 %v634_v17, %v2243_v58  ;;  %v1459_v53 = vld [vmem:[%s2658_s0 + $0x108] sm:$0xff] }
 0x1ff   :  { %v2329_v20 = vadd.f32 %v649_v62, %v645_v60  ;;  %1910 = vtanh.f32 %v594_v63  ;;  %v1460_v62 = vld [vmem:[%s2658_s0 + $0x110] sm:$0xff]  ;;  %v1462_v63 = vld [vmem:[%s2658_s0 + $0x120] sm:$0xff] }
 0x200   :  { %v1901_v21 = vpop.eup %1900  ;;  %v2331_v23 = vadd.f32 %v648_v18, %v644_v0 }
 0x201   :  { %v1903_v24 = vpop.eup %1902  ;;  %1912 = vtanh.f32 %v2329_v20  ;;  %v651_v49 = vmul.f32 %v1901_v21, %v631_v19 }
 0x202   :  { %1914 = vtanh.f32 %v2331_v23  ;;  %v650_v51 = vmul.f32 %v1903_v24, %v630_v22  ;;  %v1465_v24 = vld [vmem:[%s2658_s0 + $0x138] sm:$0xff] }
 0x203   :  { %v2337_v27 = vadd.f32 %v651_v49, %v647_v25  ;;  %v1464_v25 = vld [vmem:[%s2658_s0 + $0x130] sm:$0xff] }
 0x204   :  { %v1905_v28 = vpop.eup %1904  ;;  %v2339_v29 = vadd.f32 %v650_v51, %v646_v26 }
 0x205   :  { %v1907_v30 = vpop.eup %1906  ;;  %1916 = vtanh.f32 %v2337_v27  ;;  %v625_v31 = vmul.f32 0.5, %v1905_v28 }
 0x206   :  { %1918 = vtanh.f32 %v2339_v29  ;;  %v624_v57 = vmul.f32 0.5, %v1907_v30  ;;  %v1467_v30 = vld [vmem:[%s2658_s0 + $0x148] sm:$0xff] }
 0x207   :  { %v641_v33 = vadd.f32 0.5, %v625_v31  ;;  %v1466_v31 = vld [vmem:[%s2658_s0 + $0x140] sm:$0xff] }
 0x208   :  { %v1909_v32 = vpop.eup %1908  ;;  %v640_v35 = vadd.f32 0.5, %v624_v57 }
 0x209   :  { %v1911_v34 = vpop.eup %1910  ;;  %v627_v58 = vmul.f32 0.5, %v1909_v32 }
 0x20a   :  { %v626_v36 = vmul.f32 0.5, %v1911_v34 }
 0x20b   :  { %v1913_v37 = vpop.eup %1912  ;;  %v643_v39 = vadd.f32 0.5, %v627_v58 }
 0x20c   :  { %v1915_v38 = vpop.eup %1914  ;;  %v661_v40 = vmul.f32 %v1913_v37, %v641_v33  ;;  %v642_v41 = vadd.f32 0.5, %v626_v36  ;;  %v1468_v36 = vld [vmem:[%s2658_s0 + $0x150] sm:$0xff] }
 0x20d   :  { %v660_v42 = vmul.f32 %v1915_v38, %v640_v35  ;;  %v1469_v35 = vld [vmem:[%s2658_s0 + $0x158] sm:$0xff] }
 0x20f   :  { %v1917_v43 = vpop.eup %1916  ;;  %v1813_v44 = vpack.c.bf16 %v661_v40, %v660_v42 }
 0x210   :  { %v1919_v45 = vpop.eup %1918  ;;  %v663_v46 = vmul.f32 %v1917_v43, %v643_v39 }
 0x211   :  { %1814 = vmatprep.subr.bf16.mxu0 %v1813_v44  ;;  %v662_v47 = vmul.f32 %v1919_v45, %v642_v41  ;;  %v1471_v45 = vld [vmem:[%s2658_s0 + $0x168] sm:$0xff] }
 0x212   :  { %1816 = vmatpush3.bf16.msra.mxu0 %v1813_v44 }
 0x213   :  { %v1817_v48 = vpack.c.bf16 %v663_v46, %v662_v47 }
 0x215   :  { %1818 = vmatprep.subr.bf16.mxu0 %v1817_v48 }
 0x216   :  { %1820 = vmatpush3.bf16.msra.mxu0 %v1817_v48  ;;  %v1470_v48 = vld [vmem:[%s2658_s0 + $0x160] sm:$0xff] }
 0x219   :  { %1718 = vmatmul.mubr.msk.f32.vlgmr.msra.gmra.mrb[8].mxu0 %vm140_vm0, %v2079_v2 }
 0x21a   :  { %1720 = vmatprep.mubr.msk.f32.mxu0 %vm140_vm0, %v2084_v3 }
 0x21d   :  { %1721 = vmatmul.mubr.msk.f32.gmra.mrb[10].mxu0 %vm140_vm0, %v2112_v7 }
 0x21e   :  { %1723 = vmatprep.mubr.msk.f32.mxu0 %vm140_vm0, %v2119_v8 }
 0x221   :  { %1724 = vmatmul.mubr.msk.f32.gmra.mrb[12].mxu0 %vm140_vm0, %v2140_v11 }
 0x222   :  { %1726 = vmatprep.mubr.msk.f32.mxu0 %vm140_vm0, %v2147_v12 }
 0x225   :  { %1727 = vmatmul.mubr.msk.f32.gmra.mrb[14].mxu0 %vm140_vm0, %v2168_v15 }
 0x226   :  { %1729 = vmatprep.mubr.msk.f32.mxu0 %vm140_vm0, %v2091_v4 }
 0x229   :  { %1730 = vmatmul.mubr.msk.f32.gmra.mrb[16].mxu0 %vm140_vm0, %v2096_v5 }
 0x22a   :  { %1732 = vmatprep.mubr.msk.f32.mxu0 %vm140_vm0, %v2103_v6 }
 0x22d   :  { %1733 = vmatmul.mubr.msk.f32.gmra.mrb[18].mxu0 %vm140_vm0, %v2126_v9 }
 0x22e   :  { %1735 = vmatprep.mubr.msk.f32.mxu0 %vm140_vm0, %v2133_v10 }
 0x231   :  { %1736 = vmatmul.mubr.msk.f32.gmra.mrb[20].mxu0 %vm140_vm0, %v2154_v13 }
 0x232   :  { %1738 = vmatprep.mubr.msk.f32.mxu0 %vm140_vm0, %v2161_v14 }
 0x235   :  { %1739 = vmatmul.mubr.msk.f32.gmra.mrb[22].mxu0 %vm140_vm0, %v2177_v16 }
 0x236   :  { %1781 = vmatprep.mubr.msk.f32.mxu0 %vm140_vm0, %v2074_v1  ;;  %v1463_v1 = vld [vmem:[%s2658_s0 + $0x128] sm:$0xff] }
 0x2ec   :  { %v1719_v50 = vpop.f32.mrb[8].mxu0 }
 0x2ed   :  { %v747_v52 = vpop.f32.mrb[9].mxu0  ;;  %v827_v56 = vadd.f32 %v1719_v50, %v1459_v53 }
 0x2ee   :  { %v826_v60 = vadd.f32 %v1458_v54, %v747_v52 }
 0x2ef   :  { %1920 = vtanh.f32 %v827_v56 }
 0x2f0   :  { %v1722_v55 = vpop.f32.mrb[10].mxu0  ;;  %1922 = vtanh.f32 %v826_v60 }
 0x2f1   :  { %v757_v59 = vpop.f32.mrb[11].mxu0  ;;  %v829_v17 = vadd.f32 %v1722_v55, %v1461_v61 }
 0x2f2   :  { %v828_v21 = vadd.f32 %v1460_v62, %v757_v59 }
 0x2f4   :  { %v1725_v0 = vpop.f32.mrb[12].mxu0 }
 0x2f5   :  { %v831_v18 = vadd.f32 %v1725_v0, %v1463_v1  ;;  %v767_v19 = vpop.f32.mrb[13].mxu0 }
 0x2f6   :  { %v830_v22 = vadd.f32 %v1462_v63, %v767_v19  ;;  %v1473_v63 = vld [vmem:[%s2658_s0 + $0x178] sm:$0xff] }
 0x2f7   :  { %1924 = vtanh.f32 %v831_v18  ;;  %v1472_v18 = vld [vmem:[%s2658_s0 + $0x170] sm:$0xff] }
 0x2f8   :  { %1926 = vtanh.f32 %v830_v22  ;;  %v1728_v49 = vpop.f32.mrb[14].mxu0 }
 0x2f9   :  { %1928 = vtanh.f32 %v829_v17  ;;  %v833_v26 = vadd.f32 %v1728_v49, %v1465_v24  ;;  %v777_v51 = vpop.f32.mrb[15].mxu0  ;;  %v1921_v58 = vpop.eup %1920 }
 0x2fa   :  { %1930 = vtanh.f32 %v828_v21  ;;  %v832_v28 = vadd.f32 %v1464_v25, %v777_v51  ;;  %v1923_v37 = vpop.eup %1922  ;;  %v859_v52 = vmul.f32 0.5, %v1921_v58 }
 0x2fb   :  { %1932 = vtanh.f32 %v833_v26  ;;  %v858_v55 = vmul.f32 0.5, %v1923_v37 }
 0x2fc   :  { %1934 = vtanh.f32 %v832_v28  ;;  %v1731_v57 = vpop.f32.mrb[16].mxu0  ;;  %v875_v19 = vadd.f32 0.5, %v859_v52 }
 0x2fd   :  { %v835_v32 = vadd.f32 %v1731_v57, %v1467_v30  ;;  %v787_v33 = vpop.f32.mrb[17].mxu0  ;;  %v874_v25 = vadd.f32 0.5, %v858_v55 }
 0x2fe   :  { %v834_v34 = vadd.f32 %v1466_v31, %v787_v33 }
 0x2ff   :  { %1936 = vtanh.f32 %v835_v32 }
 0x300   :  { %1938 = vtanh.f32 %v834_v34  ;;  %v1734_v38 = vpop.f32.mrb[18].mxu0 }
 0x301   :  { %v1925_v39 = vpop.eup %1924  ;;  %v837_v40 = vadd.f32 %v1734_v38, %v1469_v35  ;;  %v797_v41 = vpop.f32.mrb[19].mxu0 }
 0x302   :  { %v1927_v42 = vpop.eup %1926  ;;  %v863_v43 = vmul.f32 0.5, %v1925_v39  ;;  %v836_v44 = vadd.f32 %v1468_v36, %v797_v41 }
 0x303   :  { %v1929_v46 = vpop.eup %1928  ;;  %v862_v47 = vmul.f32 0.5, %v1927_v42  ;;  %1940 = vtanh.f32 %v837_v40 }
 0x304   :  { %v1931_v50 = vpop.eup %1930  ;;  %1942 = vtanh.f32 %v836_v44  ;;  %v1737_v53 = vpop.f32.mrb[20].mxu0  ;;  %v879_v61 = vadd.f32 0.5, %v863_v43  ;;  %v861_v21 = vmul.f32 0.5, %v1929_v46 }
 0x305   :  { %v1933_v54 = vpop.eup %1932  ;;  %v839_v56 = vadd.f32 %v1737_v53, %v1471_v45  ;;  %v807_v59 = vpop.f32.mrb[21].mxu0  ;;  %v878_v0 = vadd.f32 0.5, %v862_v47  ;;  %v860_v49 = vmul.f32 0.5, %v1931_v50 }
 0x306   :  { %v1935_v60 = vpop.eup %1934  ;;  %v865_v1 = vmul.f32 0.5, %v1933_v54  ;;  %v838_v62 = vadd.f32 %v1470_v48, %v807_v59  ;;  %v891_v30 = vmul.f32 %v879_v61, %v2329_v20  ;;  %v877_v58 = vadd.f32 0.5, %v861_v21 }
 0x307   :  { %v864_v17 = vmul.f32 0.5, %v1935_v60  ;;  %1944 = vtanh.f32 %v839_v56  ;;  %v890_v33 = vmul.f32 %v878_v0, %v2331_v23  ;;  %v876_v38 = vadd.f32 0.5, %v860_v49  ;;  %v1496_v49 = vld [vmem:[%s2658_s0 + $0x1b0] sm:$0xff] }
 0x308   :  { %1946 = vtanh.f32 %v838_v62  ;;  %v1740_v22 = vpop.f32.mrb[22].mxu0  ;;  %v881_v31 = vadd.f32 0.5, %v865_v1 }
 0x309   :  { %v1937_v24 = vpop.eup %1936  ;;  %v841_v26 = vadd.f32 %v1740_v22, %v1473_v63  ;;  %v817_v51 = vpop.f32.mrb[23].mxu0  ;;  %v880_v34 = vadd.f32 0.5, %v864_v17 }
 0x30a   :  { %v1939_v28 = vpop.eup %1938  ;;  %v895_v57 = vmul.f32 %v1937_v24, %v875_v19  ;;  %v840_v32 = vadd.f32 %v1472_v18, %v817_v51  ;;  %v893_v41 = vmul.f32 %v881_v31, %v2337_v27  ;;  %v1499_v31 = vld [vmem:[%s2658_s0 + $0x1c8] sm:$0xff] }
 0x30b   :  { %v894_v35 = vmul.f32 %v1939_v28, %v874_v25  ;;  %1948 = vtanh.f32 %v841_v26  ;;  %v892_v42 = vmul.f32 %v880_v34, %v2339_v29  ;;  %v1497_v25 = vld [vmem:[%s2658_s0 + $0x1b8] sm:$0xff] }
 0x30c   :  { %v2425_v36 = vadd.f32 %v895_v57, %v891_v30  ;;  %1950 = vtanh.f32 %v840_v32  ;;  %v1498_v57 = vld [vmem:[%s2658_s0 + $0x1c0] sm:$0xff] }
 0x30d   :  { %v1941_v37 = vpop.eup %1940  ;;  %v2427_v39 = vadd.f32 %v894_v35, %v890_v33 }
 0x30e   :  { %v1943_v40 = vpop.eup %1942  ;;  %1952 = vtanh.f32 %v2425_v36  ;;  %v897_v20 = vmul.f32 %v1941_v37, %v877_v58  ;;  %v1501_v58 = vld [vmem:[%s2658_s0 + $0x1d8] sm:$0xff] }
 0x30f   :  { %1954 = vtanh.f32 %v2427_v39  ;;  %v896_v23 = vmul.f32 %v1943_v40, %v876_v38  ;;  %v1500_v38 = vld [vmem:[%s2658_s0 + $0x1d0] sm:$0xff] }
 0x310   :  { %v2433_v43 = vadd.f32 %v897_v20, %v893_v41 }
 0x311   :  { %v1945_v44 = vpop.eup %1944  ;;  %v2435_v45 = vadd.f32 %v896_v23, %v892_v42 }
 0x312   :  { %v1947_v46 = vpop.eup %1946  ;;  %1956 = vtanh.f32 %v2433_v43  ;;  %v871_v47 = vmul.f32 0.5, %v1945_v44 }
 0x313   :  { %1958 = vtanh.f32 %v2435_v45  ;;  %v870_v27 = vmul.f32 0.5, %v1947_v46 }
 0x314   :  { %v887_v50 = vadd.f32 0.5, %v871_v47 }
 0x315   :  { %v1949_v48 = vpop.eup %1948  ;;  %v886_v53 = vadd.f32 0.5, %v870_v27  ;;  %v1503_v27 = vld [vmem:[%s2658_s0 + $0x1e8] sm:$0xff] }
 0x316   :  { %v1951_v52 = vpop.eup %1950  ;;  %v873_v29 = vmul.f32 0.5, %v1949_v48 }
 0x317   :  { %v872_v54 = vmul.f32 0.5, %v1951_v52  ;;  %v1502_v52 = vld [vmem:[%s2658_s0 + $0x1e0] sm:$0xff] }
 0x318   :  { %v1953_v55 = vpop.eup %1952  ;;  %v889_v59 = vadd.f32 0.5, %v873_v29 }
 0x319   :  { %v1955_v56 = vpop.eup %1954  ;;  %v907_v60 = vmul.f32 %v1953_v55, %v887_v50  ;;  %v888_v61 = vadd.f32 0.5, %v872_v54 }
 0x31a   :  { %v906_v1 = vmul.f32 %v1955_v56, %v886_v53 }
 0x31c   :  { %v1957_v62 = vpop.eup %1956  ;;  %v1821_v63 = vpack.c.bf16 %v907_v60, %v906_v1 }
 0x31d   :  { %v1959_v0 = vpop.eup %1958  ;;  %v909_v17 = vmul.f32 %v1957_v62, %v889_v59 }
 0x31e   :  { %1822 = vmatprep.subr.bf16.mxu1 %v1821_v63  ;;  %v908_v18 = vmul.f32 %v1959_v0, %v888_v61  ;;  %v1505_v0 = vld [vmem:[%s2658_s0 + $0x1f8] sm:$0xff] }
 0x31f   :  { %1824 = vmatpush3.bf16.msra.mxu1 %v1821_v63 }
 0x320   :  { %v1825_v19 = vpack.c.bf16 %v909_v17, %v908_v18 }
 0x322   :  { %1826 = vmatprep.subr.bf16.mxu1 %v1825_v19 }
 0x323   :  { %1828 = vmatpush3.bf16.msra.mxu1 %v1825_v19  ;;  %v1504_v19 = vld [vmem:[%s2658_s0 + $0x1f0] sm:$0xff] }
 0x326   :  { %1750 = vmatmul.mubr.msk.f32.vlgmr.msra.gmra.mrb[24].mxu1 %vm140_vm0, %v2079_v2 }
 0x327   :  { %1752 = vmatprep.mubr.msk.f32.mxu1 %vm140_vm0, %v2084_v3 }
 0x32a   :  { %1753 = vmatmul.mubr.msk.f32.gmra.mrb[26].mxu1 %vm140_vm0, %v2112_v7 }
 0x32b   :  { %1755 = vmatprep.mubr.msk.f32.mxu1 %vm140_vm0, %v2119_v8 }
 0x32e   :  { %1756 = vmatmul.mubr.msk.f32.gmra.mrb[28].mxu1 %vm140_vm0, %v2140_v11  ;;  %v1495_v11 = vld [vmem:[%s2658_s0 + $0x1a8] sm:$0xff] }
 0x32f   :  { %1758 = vmatprep.mubr.msk.f32.mxu1 %vm140_vm0, %v2147_v12  ;;  %v1492_v12 = vld [vmem:[%s2658_s0 + $0x190] sm:$0xff] }
 0x332   :  { %1759 = vmatmul.mubr.msk.f32.gmra.mrb[30].mxu1 %vm140_vm0, %v2168_v15 }
 0x333   :  { %1761 = vmatprep.mubr.msk.f32.mxu1 %vm140_vm0, %v2091_v4  ;;  %v1491_v4 = vld [vmem:[%s2658_s0 + $0x188] sm:$0xff] }
 0x336   :  { %1762 = vmatmul.mubr.msk.f32.gmra.mrb[32].mxu1 %vm140_vm0, %v2096_v5  ;;  %v1490_v5 = vld [vmem:[%s2658_s0 + $0x180] sm:$0xff] }
 0x337   :  { %1764 = vmatprep.mubr.msk.f32.mxu1 %vm140_vm0, %v2103_v6 }
 0x33a   :  { %1765 = vmatmul.mubr.msk.f32.gmra.mrb[34].mxu1 %vm140_vm0, %v2126_v9 }
 0x33b   :  { %1767 = vmatprep.mubr.msk.f32.mxu1 %vm140_vm0, %v2133_v10  ;;  %v1493_v10 = vld [vmem:[%s2658_s0 + $0x198] sm:$0xff] }
 0x33e   :  { %1768 = vmatmul.mubr.msk.f32.gmra.mrb[36].mxu1 %vm140_vm0, %v2154_v13  ;;  %v1494_v13 = vld [vmem:[%s2658_s0 + $0x1a0] sm:$0xff] }
 0x33f   :  { %1770 = vmatprep.mubr.msk.f32.mxu1 %vm140_vm0, %v2161_v14 }
 0x342   :  { %1771 = vmatmul.mubr.msk.f32.gmra.mrb[38].mxu1 %vm140_vm0, %v2177_v16 }
 0x3f9   :  { %v1751_v2 = vpop.f32.mrb[24].mxu1 }
 0x3fa   :  { %v993_v3 = vpop.f32.mrb[25].mxu1  ;;  %v1073_v7 = vadd.f32 %v1751_v2, %v1491_v4 }
 0x3fb   :  { %v1072_v9 = vadd.f32 %v1490_v5, %v993_v3 }
 0x3fc   :  { %1960 = vtanh.f32 %v1073_v7 }
 0x3fd   :  { %v1754_v6 = vpop.f32.mrb[26].mxu1  ;;  %1962 = vtanh.f32 %v1072_v9 }
 0x3fe   :  { %v1003_v8 = vpop.f32.mrb[27].mxu1  ;;  %v1075_v15 = vadd.f32 %v1754_v6, %v1493_v10 }
 0x3ff   :  { %v1074_v22 = vadd.f32 %v1492_v12, %v1003_v8 }
 0x401   :  { %v1757_v14 = vpop.f32.mrb[28].mxu1 }
 0x402   :  { %v1077_v16 = vadd.f32 %v1757_v14, %v1495_v11  ;;  %v1013_v21 = vpop.f32.mrb[29].mxu1 }
 0x403   :  { %v1076_v24 = vadd.f32 %v1494_v13, %v1013_v21 }
 0x404   :  { %1964 = vtanh.f32 %v1077_v16 }
 0x405   :  { %1966 = vtanh.f32 %v1076_v24  ;;  %v1760_v26 = vpop.f32.mrb[30].mxu1 }
 0x406   :  { %1968 = vtanh.f32 %v1075_v15  ;;  %v1079_v51 = vadd.f32 %v1760_v26, %v1497_v25  ;;  %v1023_v28 = vpop.f32.mrb[31].mxu1  ;;  %v1961_v37 = vpop.eup %1960 }
 0x407   :  { %1970 = vtanh.f32 %v1074_v22  ;;  %v1078_v30 = vadd.f32 %v1496_v49, %v1023_v28  ;;  %v1963_v40 = vpop.eup %1962  ;;  %v1105_v29 = vmul.f32 0.5, %v1961_v37 }
 0x408   :  { %1972 = vtanh.f32 %v1079_v51  ;;  %v1104_v56 = vmul.f32 0.5, %v1963_v40 }
 0x409   :  { %1974 = vtanh.f32 %v1078_v30  ;;  %v1763_v32 = vpop.f32.mrb[32].mxu1  ;;  %v1121_v2 = vadd.f32 0.5, %v1105_v29  ;;  %v2040_v29 = vld [vmem:[%s2657_s1 + $0x8] sm:$0xff] }
 0x40a   :  { %v1081_v33 = vadd.f32 %v1763_v32, %v1499_v31  ;;  %v1033_v34 = vpop.f32.mrb[33].mxu1  ;;  %v1120_v6 = vadd.f32 0.5, %v1104_v56  ;;  %v2043_v56 = vld [vmem:[%s2657_s1 + $0x20] sm:$0xff] }
 0x40b   :  { %v1080_v35 = vadd.f32 %v1498_v57, %v1033_v34 }
 0x40c   :  { %1976 = vtanh.f32 %v1081_v33 }
 0x40d   :  { %1978 = vtanh.f32 %v1080_v35  ;;  %v1766_v41 = vpop.f32.mrb[34].mxu1 }
 0x40e   :  { %v1965_v20 = vpop.eup %1964  ;;  %v1083_v42 = vadd.f32 %v1766_v41, %v1501_v58  ;;  %v1043_v23 = vpop.f32.mrb[35].mxu1 }
 0x40f   :  { %v1967_v44 = vpop.eup %1966  ;;  %v1109_v46 = vmul.f32 0.5, %v1965_v20  ;;  %v1082_v47 = vadd.f32 %v1500_v38, %v1043_v23 }
 0x410   :  { %v1969_v48 = vpop.eup %1968  ;;  %v1108_v50 = vmul.f32 0.5, %v1967_v44  ;;  %1980 = vtanh.f32 %v1083_v42 }
 0x411   :  { %v1971_v53 = vpop.eup %1970  ;;  %1982 = vtanh.f32 %v1082_v47  ;;  %v1769_v54 = vpop.f32.mrb[36].mxu1  ;;  %v1125_v1 = vadd.f32 0.5, %v1109_v46  ;;  %v1107_v3 = vmul.f32 0.5, %v1969_v48 }
 0x412   :  { %v1973_v55 = vpop.eup %1972  ;;  %v1085_v59 = vadd.f32 %v1769_v54, %v1503_v27  ;;  %v1053_v60 = vpop.f32.mrb[37].mxu1  ;;  %v1124_v17 = vadd.f32 0.5, %v1108_v50  ;;  %v1106_v7 = vmul.f32 0.5, %v1971_v53  ;;  %v2041_v54 = vld [vmem:[%s2657_s1 + $0x10] sm:$0xff] }
 0x413   :  { %v1975_v61 = vpop.eup %1974  ;;  %v1111_v62 = vmul.f32 0.5, %v1973_v55  ;;  %v1084_v63 = vadd.f32 %v1502_v52, %v1053_v60  ;;  %v1137_v11 = vmul.f32 %v1125_v1, %v2425_v36  ;;  %v1123_v22 = vadd.f32 0.5, %v1107_v3  ;;  %v2042_v55 = vld [vmem:[%s2657_s1 + $0x18] sm:$0xff]  ;;  %v2045_v60 = vld [vmem:[%s2657_s1 + $0x30] sm:$0xff]  ;;  %v2047_v1 = vld [vmem:[%s2657_s1 + $0x40] sm:$0xff] }
 0x414   :  { %v1110_v18 = vmul.f32 0.5, %v1975_v61  ;;  %1984 = vtanh.f32 %v1085_v59  ;;  %v1136_v15 = vmul.f32 %v1124_v17, %v2427_v39  ;;  %v1122_v49 = vadd.f32 0.5, %v1106_v7  ;;  %v2044_v59 = vld [vmem:[%s2657_s1 + $0x28] sm:$0xff]  ;;  %v2046_v61 = vld [vmem:[%s2657_s1 + $0x38] sm:$0xff]  ;;  %v2051_v17 = vld [vmem:[%s2657_s1 + $0x60] sm:$0xff] }
 0x415   :  { %1986 = vtanh.f32 %v1084_v63  ;;  %v1772_v4 = vpop.f32.mrb[38].mxu1  ;;  %v1127_v12 = vadd.f32 0.5, %v1111_v62  ;;  %v2048_v62 = vld [vmem:[%s2657_s1 + $0x48] sm:$0xff]  ;;  %v2049_v63 = vld [vmem:[%s2657_s1 + $0x50] sm:$0xff] }
 0x416   :  { %v1977_v5 = vpop.eup %1976  ;;  %v1087_v8 = vadd.f32 %v1772_v4, %v1505_v0  ;;  %v1063_v9 = vpop.f32.mrb[39].mxu1  ;;  %v1126_v16 = vadd.f32 0.5, %v1110_v18  ;;  %v2050_v0 = vld [vmem:[%s2657_s1 + $0x58] sm:$0xff]  ;;  %v2052_v18 = vld [vmem:[%s2657_s1 + $0x68] sm:$0xff] }
 0x417   :  { %v1979_v10 = vpop.eup %1978  ;;  %v1141_v13 = vmul.f32 %v1977_v5, %v1121_v2  ;;  %v1086_v14 = vadd.f32 %v1504_v19, %v1063_v9  ;;  %v1139_v28 = vmul.f32 %v1127_v12, %v2433_v43  ;;  %v2053_v19 = vld [vmem:[%s2657_s1 + $0x70] sm:$0xff]  ;;  %v2054_v2 = vld [vmem:[%s2657_s1 + $0x78] sm:$0xff]  ;;  %v1523_v5 = vld [vmem:[%s2658_s0 + $0x208] sm:$0xff] }
 0x418   :  { %v1140_v21 = vmul.f32 %v1979_v10, %v1120_v6  ;;  %1988 = vtanh.f32 %v1087_v8  ;;  %v1138_v30 = vmul.f32 %v1126_v16, %v2435_v45  ;;  %v1522_v6 = vld [vmem:[%s2658_s0 + $0x200] sm:$0xff]  ;;  %v1527_v12 = vld [vmem:[%s2658_s0 + $0x228] sm:$0xff] }
 0x419   :  { %v2519_v24 = vadd.f32 %v1141_v13, %v1137_v11  ;;  %1990 = vtanh.f32 %v1086_v14  ;;  %v1525_v11 = vld [vmem:[%s2658_s0 + $0x218] sm:$0xff]  ;;  %v1524_v13 = vld [vmem:[%s2658_s0 + $0x210] sm:$0xff]  ;;  %v1526_v14 = vld [vmem:[%s2658_s0 + $0x220] sm:$0xff] }
 0x41a   :  { %v1981_v25 = vpop.eup %1980  ;;  %v2521_v26 = vadd.f32 %v1140_v21, %v1136_v15 }
 0x41b   :  { %v1983_v51 = vpop.eup %1982  ;;  %1992 = vtanh.f32 %v2519_v24  ;;  %v1143_v36 = vmul.f32 %v1981_v25, %v1123_v22 }
 0x41c   :  { %1994 = vtanh.f32 %v2521_v26  ;;  %v1142_v39 = vmul.f32 %v1983_v51, %v1122_v49  ;;  %v1529_v51 = vld [vmem:[%s2658_s0 + $0x238] sm:$0xff] }
 0x41d   :  { %v2527_v31 = vadd.f32 %v1143_v36, %v1139_v28  ;;  %v1528_v28 = vld [vmem:[%s2658_s0 + $0x230] sm:$0xff] }
 0x41e   :  { %v1985_v57 = vpop.eup %1984  ;;  %v2529_v32 = vadd.f32 %v1142_v39, %v1138_v30 }
 0x41f   :  { %v1987_v33 = vpop.eup %1986  ;;  %1996 = vtanh.f32 %v2527_v31  ;;  %v1117_v34 = vmul.f32 0.5, %v1985_v57 }
 0x420   :  { %1998 = vtanh.f32 %v2529_v32  ;;  %v1116_v43 = vmul.f32 0.5, %v1987_v33  ;;  %v1531_v33 = vld [vmem:[%s2658_s0 + $0x248] sm:$0xff] }
 0x421   :  { %v1133_v58 = vadd.f32 0.5, %v1117_v34  ;;  %v1530_v34 = vld [vmem:[%s2658_s0 + $0x240] sm:$0xff] }
 0x422   :  { %v1989_v35 = vpop.eup %1988  ;;  %v1132_v38 = vadd.f32 0.5, %v1116_v43 }
 0x423   :  { %v1991_v37 = vpop.eup %1990  ;;  %v1119_v45 = vmul.f32 0.5, %v1989_v35 }
 0x424   :  { %v1118_v40 = vmul.f32 0.5, %v1991_v37 }
 0x425   :  { %v1993_v41 = vpop.eup %1992  ;;  %v1135_v42 = vadd.f32 0.5, %v1119_v45 }
 0x426   :  { %v1995_v20 = vpop.eup %1994  ;;  %v1153_v23 = vmul.f32 %v1993_v41, %v1133_v58  ;;  %v1134_v44 = vadd.f32 0.5, %v1118_v40  ;;  %v1532_v40 = vld [vmem:[%s2658_s0 + $0x250] sm:$0xff] }
 0x427   :  { %v1152_v46 = vmul.f32 %v1995_v20, %v1132_v38  ;;  %v1533_v38 = vld [vmem:[%s2658_s0 + $0x258] sm:$0xff] }
 0x429   :  { %v1997_v47 = vpop.eup %1996  ;;  %v1829_v27 = vpack.c.bf16 %v1153_v23, %v1152_v46 }
 0x42a   :  { %v1999_v48 = vpop.eup %1998  ;;  %v1155_v50 = vmul.f32 %v1997_v47, %v1135_v42 }
 0x42b   :  { %1830 = vmatprep.subr.bf16.mxu0 %v1829_v27  ;;  %v1154_v52 = vmul.f32 %v1999_v48, %v1134_v44  ;;  %v1535_v48 = vld [vmem:[%s2658_s0 + $0x268] sm:$0xff] }
 0x42c   :  { %1832 = vmatpush3.bf16.msra.mxu0 %v1829_v27 }
 0x42d   :  { %v1833_v53 = vpack.c.bf16 %v1155_v50, %v1154_v52 }
 0x42f   :  { %1834 = vmatprep.subr.bf16.mxu0 %v1833_v53 }
 0x430   :  { %1836 = vmatpush3.bf16.msra.mxu0 %v1833_v53  ;;  %v1534_v53 = vld [vmem:[%s2658_s0 + $0x260] sm:$0xff] }
 0x433   :  { %1782 = vmatmul.mubr.msk.f32.vlgmr.msra.gmra.mrb[24].mxu0 %vm140_vm0, %v2040_v29 }
 0x434   :  { %1784 = vmatprep.mubr.msk.f32.mxu0 %vm140_vm0, %v2041_v54 }
 0x437   :  { %1785 = vmatmul.mubr.msk.f32.gmra.mrb[26].mxu0 %vm140_vm0, %v2042_v55 }
 0x438   :  { %1787 = vmatprep.mubr.msk.f32.mxu0 %vm140_vm0, %v2043_v56 }
 0x43b   :  { %1788 = vmatmul.mubr.msk.f32.gmra.mrb[28].mxu0 %vm140_vm0, %v2044_v59 }
 0x43c   :  { %1790 = vmatprep.mubr.msk.f32.mxu0 %vm140_vm0, %v2045_v60 }
 0x43f   :  { %1791 = vmatmul.mubr.msk.f32.gmra.mrb[30].mxu0 %vm140_vm0, %v2046_v61 }
 0x440   :  { %1793 = vmatprep.mubr.msk.f32.mxu0 %vm140_vm0, %v2047_v1 }
 0x443   :  { %1794 = vmatmul.mubr.msk.f32.gmra.mrb[32].mxu0 %vm140_vm0, %v2048_v62 }
 0x444   :  { %1796 = vmatprep.mubr.msk.f32.mxu0 %vm140_vm0, %v2049_v63 }
 0x447   :  { %1797 = vmatmul.mubr.msk.f32.gmra.mrb[34].mxu0 %vm140_vm0, %v2050_v0 }
 0x448   :  { %1799 = vmatprep.mubr.msk.f32.mxu0 %vm140_vm0, %v2051_v17  ;;  %v1537_v17 = vld [vmem:[%s2658_s0 + $0x278] sm:$0xff] }
 0x44b   :  { %1800 = vmatmul.mubr.msk.f32.gmra.mrb[36].mxu0 %vm140_vm0, %v2052_v18 }
 0x44c   :  { %1802 = vmatprep.mubr.msk.f32.mxu0 %vm140_vm0, %v2053_v19 }
 0x44f   :  { %1803 = vmatmul.mubr.msk.f32.gmra.mrb[38].mxu0 %vm140_vm0, %v2054_v2  ;;  %v1536_v2 = vld [vmem:[%s2658_s0 + $0x270] sm:$0xff] }
 0x506   :  { %v1783_v3 = vpop.f32.mrb[24].mxu0 }
 0x507   :  { %v1239_v4 = vpop.f32.mrb[25].mxu0  ;;  %v1319_v8 = vadd.f32 %v1783_v3, %v1523_v5 }
 0x508   :  { %v1318_v10 = vadd.f32 %v1522_v6, %v1239_v4 }
 0x509   :  { %2000 = vtanh.f32 %v1319_v8 }
 0x50a   :  { %v1786_v7 = vpop.f32.mrb[26].mxu0  ;;  %2002 = vtanh.f32 %v1318_v10 }
 0x50b   :  { %v1249_v9 = vpop.f32.mrb[27].mxu0  ;;  %v1321_v16 = vadd.f32 %v1786_v7, %v1525_v11 }
 0x50c   :  { %v1320_v25 = vadd.f32 %v1524_v13, %v1249_v9 }
 0x50e   :  { %v1789_v15 = vpop.f32.mrb[28].mxu0 }
 0x50f   :  { %v1323_v21 = vadd.f32 %v1789_v15, %v1527_v12  ;;  %v1259_v22 = vpop.f32.mrb[29].mxu0 }
 0x510   :  { %v1322_v49 = vadd.f32 %v1526_v14, %v1259_v22 }
 0x511   :  { %2004 = vtanh.f32 %v1323_v21 }
 0x512   :  { %2006 = vtanh.f32 %v1322_v49  ;;  %v1792_v36 = vpop.f32.mrb[30].mxu0 }
 0x513   :  { %2008 = vtanh.f32 %v1321_v16  ;;  %v1325_v30 = vadd.f32 %v1792_v36, %v1529_v51  ;;  %v1269_v39 = vpop.f32.mrb[31].mxu0  ;;  %v2001_v45 = vpop.eup %2000 }
 0x514   :  { %2010 = vtanh.f32 %v1320_v25  ;;  %v1324_v57 = vadd.f32 %v1528_v28, %v1269_v39  ;;  %v2003_v41 = vpop.eup %2002  ;;  %v1351_v54 = vmul.f32 0.5, %v2001_v45 }
 0x515   :  { %2012 = vtanh.f32 %v1325_v30  ;;  %v1350_v59 = vmul.f32 0.5, %v2003_v41 }
 0x516   :  { %2014 = vtanh.f32 %v1324_v57  ;;  %v1795_v43 = vpop.f32.mrb[32].mxu0  ;;  %v1367_v3 = vadd.f32 0.5, %v1351_v54 }
 0x517   :  { %v1327_v35 = vadd.f32 %v1795_v43, %v1531_v33  ;;  %v1279_v58 = vpop.f32.mrb[33].mxu0  ;;  %v1366_v7 = vadd.f32 0.5, %v1350_v59 }
 0x518   :  { %v1326_v37 = vadd.f32 %v1530_v34, %v1279_v58 }
 0x519   :  { %2016 = vtanh.f32 %v1327_v35 }
 0x51a   :  { %2018 = vtanh.f32 %v1326_v37  ;;  %v1798_v20 = vpop.f32.mrb[34].mxu0 }
 0x51b   :  { %v2005_v42 = vpop.eup %2004  ;;  %v1329_v23 = vadd.f32 %v1798_v20, %v1533_v38  ;;  %v1289_v44 = vpop.f32.mrb[35].mxu0 }
 0x51c   :  { %v2007_v46 = vpop.eup %2006  ;;  %v1355_v47 = vmul.f32 0.5, %v2005_v42  ;;  %v1328_v27 = vadd.f32 %v1532_v40, %v1289_v44 }
 0x51d   :  { %v2009_v50 = vpop.eup %2008  ;;  %v1354_v52 = vmul.f32 0.5, %v2007_v46  ;;  %2020 = vtanh.f32 %v1329_v23 }
 0x51e   :  { %v2011_v29 = vpop.eup %2010  ;;  %2022 = vtanh.f32 %v1328_v27  ;;  %v1801_v55 = vpop.f32.mrb[36].mxu0  ;;  %v1371_v62 = vadd.f32 0.5, %v1355_v47  ;;  %v1353_v4 = vmul.f32 0.5, %v2009_v50 }
 0x51f   :  { %v2013_v56 = vpop.eup %2012  ;;  %v1331_v60 = vadd.f32 %v1801_v55, %v1535_v48  ;;  %v1299_v61 = vpop.f32.mrb[37].mxu0  ;;  %v1370_v18 = vadd.f32 0.5, %v1354_v52  ;;  %v1352_v8 = vmul.f32 0.5, %v2011_v29 }
 0x520   :  { %v2015_v1 = vpop.eup %2014  ;;  %v1357_v63 = vmul.f32 0.5, %v2013_v56  ;;  %v1330_v0 = vadd.f32 %v1534_v53, %v1299_v61  ;;  %v1383_v12 = vmul.f32 %v1371_v62, %v2519_v24  ;;  %v1369_v25 = vadd.f32 0.5, %v1353_v4 }
 0x521   :  { %v1356_v19 = vmul.f32 0.5, %v2015_v1  ;;  %2024 = vtanh.f32 %v1331_v60  ;;  %v1382_v16 = vmul.f32 %v1370_v18, %v2521_v26  ;;  %v1368_v28 = vadd.f32 0.5, %v1352_v8 }
 0x522   :  { %2026 = vtanh.f32 %v1330_v0  ;;  %v1804_v5 = vpop.f32.mrb[38].mxu0  ;;  %v1373_v13 = vadd.f32 0.5, %v1357_v63 }
 0x523   :  { %v2017_v6 = vpop.eup %2016  ;;  %v1333_v9 = vadd.f32 %v1804_v5, %v1537_v17  ;;  %v1309_v10 = vpop.f32.mrb[39].mxu0  ;;  %v1372_v21 = vadd.f32 0.5, %v1356_v19 }
 0x524   :  { %v2019_v11 = vpop.eup %2018  ;;  %v1387_v14 = vmul.f32 %v2017_v6, %v1367_v3  ;;  %v1332_v15 = vadd.f32 %v1536_v2, %v1309_v10  ;;  %v1385_v39 = vmul.f32 %v1373_v13, %v2527_v31 }
 0x525   :  { %v1386_v22 = vmul.f32 %v2019_v11, %v1366_v7  ;;  %2028 = vtanh.f32 %v1333_v9  ;;  %v1384_v24 = vmul.f32 %v1372_v21, %v2529_v32 }
 0x526   :  { %v1391_v49 = vadd.f32 %v1387_v14, %v1383_v12  ;;  %2030 = vtanh.f32 %v1332_v15 }
 0x527   :  { %v2021_v51 = vpop.eup %2020  ;;  %v1390_v36 = vadd.f32 %v1386_v22, %v1382_v16 }
 0x528   :  { %v2023_v30 = vpop.eup %2022  ;;  %2032 = vtanh.f32 %v1391_v49  ;;  %v1389_v57 = vmul.f32 %v2021_v51, %v1369_v25 }
 0x529   :  { %2034 = vtanh.f32 %v1390_v36  ;;  %v1388_v33 = vmul.f32 %v2023_v30, %v1368_v28 }
 0x52a   :  { %v1393_v34 = vadd.f32 %v1389_v57, %v1385_v39 }
 0x52b   :  { %v2025_v26 = vpop.eup %2024  ;;  %v1392_v43 = vadd.f32 %v1388_v33, %v1384_v24 }
 0x52c   :  { %v2027_v35 = vpop.eup %2026  ;;  %2036 = vtanh.f32 %v1393_v34  ;;  %v1363_v58 = vmul.f32 0.5, %v2025_v26 }
 0x52d   :  { %2038 = vtanh.f32 %v1392_v43  ;;  %v1362_v37 = vmul.f32 0.5, %v2027_v35 }
 0x52e   :  { %v1379_v45 = vadd.f32 0.5, %v1363_v58 }
 0x52f   :  { %v2029_v38 = vpop.eup %2028  ;;  %v1378_v41 = vadd.f32 0.5, %v1362_v37 }
 0x530   :  { %v2031_v40 = vpop.eup %2030  ;;  %v1365_v20 = vmul.f32 0.5, %v2029_v38 }
 0x531   :  { %v1364_v31 = vmul.f32 0.5, %v2031_v40 }
 0x532   :  { %v2033_v42 = vpop.eup %2032  ;;  %v1381_v32 = vadd.f32 0.5, %v1365_v20 }
 0x533   :  { %v2035_v23 = vpop.eup %2034  ;;  %v1399_v44 = vmul.f32 %v2033_v42, %v1379_v45  ;;  %v1380_v47 = vadd.f32 0.5, %v1364_v31 }
 0x534   :  { %v1398_v46 = vmul.f32 %v2035_v23, %v1378_v41 }
 0x535   :  { %1403 = vst [vmem:[%s2659_s2 + $0x8] sm:$0xff] %v1399_v44 }
 0x536   :  { %v2037_v27 = vpop.eup %2036  ;;  %1402 = vst [vmem:[%s2659_s2] sm:$0xff] %v1398_v46 }
 0x537   :  { %v2039_v48 = vpop.eup %2038  ;;  %v1401_v50 = vmul.f32 %v2037_v27, %v1381_v32 }
 0x538   :  { %v1400_v52 = vmul.f32 %v2039_v48, %v1380_v47 }
 0x539   :  { %1405 = vst [vmem:[%s2659_s2 + $0x18] sm:$0xff] %v1401_v50 }
 0x53a   :  { %1404 = vst [vmem:[%s2659_s2 + $0x10] sm:$0xff] %v1400_v52 }

</bundles_post_ra>
